<compile_context>
chip_gen: v5e
topology: v5e:2x2
jax: 0.10.0
libtpu: 0.0.40
codegen_flags: <defaults>
</compile_context>

<pallas_src>
import functools

import jax
import jax.numpy as jnp
from jax.experimental import pallas as pl
from jax.experimental.pallas import tpu as pltpu

IN_FEAT = 50
HIDDEN = 64
OUT_CLS = 2

LANE = 128
SUBLANE = 8
TM = 128                              # node-row tile for the GCN layers
VMEM_LIMIT = 48 * 1024 * 1024         # < 64 MiB (v7x per-TC), < 128 MiB (v5e/v6e)


def _round_up(x, m):
    return ((x + m - 1) // m) * m


def _pad2d(x, rows, cols):
    return jnp.pad(x, ((0, rows - x.shape[0]), (0, cols - x.shape[1])))


# -----------------------------------------------------------------------------
# Kernels
# -----------------------------------------------------------------------------
def gcn_layer_kernel(a_ref, h_ref, w_ref, b_ref, o_ref, *, apply_relu):
    """One GCNConv layer for a (TM, N_pad) row block of A_hat.

    t = (A_rows @ H_in) @ W + b   -- bf16 MXU inputs, f32 accumulation.
    """
    t = jnp.dot(a_ref[...], h_ref[...], preferred_element_type=jnp.float32)
    t = jnp.dot(t.astype(jnp.bfloat16), w_ref[...],
                preferred_element_type=jnp.float32)
    t = t + b_ref[...]                      # bias / ReLU stay in f32 (v5e-safe)
    if apply_relu:
        t = jnp.maximum(t, 0.0)
    o_ref[...] = t.astype(o_ref.dtype)


def pool_linear_kernel(p_ref, h_ref, wl_ref, bl_ref, o_ref):
    """global_mean_pool (P @ H) followed by the final Linear."""
    g = jnp.dot(p_ref[...], h_ref[...], preferred_element_type=jnp.float32)
    # F.dropout(p=0.5, training=False) == identity at inference time.
    # TODO(synk): training-mode dropout (pltpu.prng_* mask) not emitted here.
    o_ref[...] = (jnp.dot(g.astype(jnp.bfloat16), wl_ref[...],
                          preferred_element_type=jnp.float32) + bl_ref[...])


# -----------------------------------------------------------------------------
# pallas_call wrappers
# -----------------------------------------------------------------------------
def _gcn_layer(a_bf, h_bf, w_bf, b_f32, *, apply_relu):
    n_pad = a_bf.shape[0]
    d_in = h_bf.shape[1]
    d_out = w_bf.shape[1]
    grid = (n_pad // TM,)

    flops = 2 * n_pad * n_pad * d_in + 2 * n_pad * d_in * d_out
    bytes_accessed = (2 * (a_bf.size + h_bf.size + w_bf.size)   # bf16 inputs
                      + 4 * b_f32.size
                      + 2 * n_pad * d_out)                      # bf16 output

    return pl.pallas_call(
        functools.partial(gcn_layer_kernel, apply_relu=apply_relu),
        out_shape=jax.ShapeDtypeStruct((n_pad, d_out), jnp.bfloat16),
        grid_spec=pltpu.PrefetchScalarGridSpec(
            num_scalar_prefetch=0,
            grid=grid,
            in_specs=[
                pl.BlockSpec((TM, n_pad), lambda i: (i, 0)),    # A row block (streamed)
                pl.BlockSpec((n_pad, d_in), lambda i: (0, 0)),  # H_in resident across grid
                pl.BlockSpec((d_in, d_out), lambda i: (0, 0)),  # W resident
                pl.BlockSpec((1, d_out), lambda i: (0, 0)),     # bias resident
            ],
            out_specs=pl.BlockSpec((TM, d_out), lambda i: (i, 0)),
        ),
        compiler_params=pltpu.CompilerParams(
            dimension_semantics=("parallel",),
            vmem_limit_bytes=VMEM_LIMIT,
        ),
        cost_estimate=pl.CostEstimate(
            flops=flops, transcendentals=0, bytes_accessed=bytes_accessed),
    )(a_bf, h_bf, w_bf, b_f32)


def _pool_linear(p_bf, h_bf, wl_bf, bl_f32):
    g_pad = p_bf.shape[0]
    out_pad = wl_bf.shape[1]
    vmem = pl.BlockSpec(memory_space=pltpu.MemorySpace.VMEM)
    return pl.pallas_call(
        pool_linear_kernel,
        out_shape=jax.ShapeDtypeStruct((g_pad, out_pad), jnp.float32),
        in_specs=[vmem] * 4,
        out_specs=vmem,
        compiler_params=pltpu.CompilerParams(vmem_limit_bytes=VMEM_LIMIT),
    )(p_bf, h_bf, wl_bf, bl_f32)


# -----------------------------------------------------------------------------
# Plain-JAX glue: adjacency / pooling matrix construction
# -----------------------------------------------------------------------------
def build_normalized_adjacency(edge_index, num_nodes):
    """Dense D^-1/2 (A + I) D^-1/2, matching torch_geometric GCNConv defaults."""
    src, dst = edge_index[0], edge_index[1]
    a = jnp.zeros((num_nodes, num_nodes), dtype=jnp.float32)
    # message flows src -> dst  => out[dst] += norm * x[src]  => A[dst, src] = 1
    a = a.at[dst, src].set(1.0)
    a = a + jnp.eye(num_nodes, dtype=jnp.float32)            # self loops
    deg = jnp.sum(a, axis=1)
    d_inv_sqrt = jnp.where(deg > 0, 1.0 / jnp.sqrt(deg), 0.0)
    return d_inv_sqrt[:, None] * a * d_inv_sqrt[None, :]


def build_mean_pool_matrix(batch, num_graphs, num_nodes):
    one_hot = (batch[None, :] == jnp.arange(num_graphs)[:, None]).astype(jnp.float32)
    counts = jnp.sum(one_hot, axis=1, keepdims=True)
    return one_hot / jnp.maximum(counts, 1.0)                 # [G, N]


def init_params(key):
    ks = jax.random.split(key, 8)
    scale = 0.1
    return {
        "w1": jax.random.normal(ks[0], (IN_FEAT, HIDDEN), jnp.float32) * scale,
        "b1": jnp.zeros((1, HIDDEN), jnp.float32),
        "w2": jax.random.normal(ks[1], (HIDDEN, HIDDEN), jnp.float32) * scale,
        "b2": jnp.zeros((1, HIDDEN), jnp.float32),
        "w3": jax.random.normal(ks[2], (HIDDEN, HIDDEN), jnp.float32) * scale,
        "b3": jnp.zeros((1, HIDDEN), jnp.float32),
        "wl": jax.random.normal(ks[3], (HIDDEN, OUT_CLS), jnp.float32) * scale,
        "bl": jax.random.normal(ks[4], (1, OUT_CLS), jnp.float32) * scale,
    }


def gcn_forward(x, edge_index, batch, num_graphs, params):
    n = x.shape[0]
    a_hat = build_normalized_adjacency(edge_index, n)
    p_mat = build_mean_pool_matrix(batch, num_graphs, n)

    # Pad everything to lane-/tile-aligned shapes (zero padding is exact).
    n_pad = _round_up(max(n, TM), TM)
    f_pad = _round_up(IN_FEAT, LANE)
    h_pad = _round_up(HIDDEN, LANE)
    o_pad = _round_up(OUT_CLS, LANE)
    g_pad = _round_up(max(num_graphs, SUBLANE), SUBLANE)

    bf = jnp.bfloat16
    a_bf = _pad2d(a_hat, n_pad, n_pad).astype(bf)
    x_bf = _pad2d(x, n_pad, f_pad).astype(bf)
    p_bf = _pad2d(p_mat, g_pad, n_pad).astype(bf)

    w1 = _pad2d(params["w1"], f_pad, h_pad).astype(bf)
    w2 = _pad2d(params["w2"], h_pad, h_pad).astype(bf)
    w3 = _pad2d(params["w3"], h_pad, h_pad).astype(bf)
    wl = _pad2d(params["wl"], h_pad, o_pad).astype(bf)
    b1 = _pad2d(params["b1"], 1, h_pad)
    b2 = _pad2d(params["b2"], 1, h_pad)
    b3 = _pad2d(params["b3"], 1, h_pad)
    bl = _pad2d(params["bl"], 1, o_pad)

    h = _gcn_layer(a_bf, x_bf, w1, b1, apply_relu=True)   # GCNConv1 + ReLU
    h = _gcn_layer(a_bf, h, w2, b2, apply_relu=True)      # GCNConv2 + ReLU
    h = _gcn_layer(a_bf, h, w3, b3, apply_relu=False)     # GCNConv3

    out = _pool_linear(p_bf, h, wl, bl)                   # mean-pool + dropout(eval) + Linear
    return out[:num_graphs, :OUT_CLS]


def gcn_forward_ref(x, edge_index, batch, num_graphs, params):
    """Pure-JAX reference emulating the same bf16-input / f32-accum arithmetic."""
    bf = jnp.bfloat16
    a = build_normalized_adjacency(edge_index, x.shape[0]).astype(bf)
    p = build_mean_pool_matrix(batch, num_graphs, x.shape[0]).astype(bf)

    def layer(h, w, b, relu):
        t = jnp.dot(a, h.astype(bf), preferred_element_type=jnp.float32)
        t = jnp.dot(t.astype(bf), w.astype(bf), preferred_element_type=jnp.float32) + b
        if relu:
            t = jnp.maximum(t, 0.0)
        return t.astype(bf)

    h = layer(x, params["w1"], params["b1"], True)
    h = layer(h, params["w2"], params["b2"], True)
    h = layer(h, params["w3"], params["b3"], False)
    g = jnp.dot(p, h, preferred_element_type=jnp.float32)
    return (jnp.dot(g.astype(bf), params["wl"].astype(bf),
                    preferred_element_type=jnp.float32) + params["bl"])


if __name__ == "__main__":
    key = jax.random.PRNGKey(0)
    k_x, k_p = jax.random.split(key)

    # Small synthetic batch of 2 graphs, 8 nodes each (N = 16 nodes total).
    N, G = 16, 2
    x = jax.random.normal(k_x, (N, IN_FEAT), jnp.float32)

    # Two 8-node rings (bidirectional edges), disjoint graphs.
    src0 = jnp.arange(8)
    dst0 = (src0 + 1) % 8
    src = jnp.concatenate([src0, dst0, src0 + 8, dst0 + 8])
    dst = jnp.concatenate([dst0, src0, dst0 + 8, src0 + 8])
    edge_index = jnp.stack([src, dst]).astype(jnp.int32)      # [2, E]

    batch = jnp.concatenate([jnp.zeros(8, jnp.int32), jnp.ones(8, jnp.int32)])

    params = init_params(k_p)

    out = gcn_forward(x, edge_index, batch, G, params)
    out = jax.block_until_ready(out)

    ref = gcn_forward_ref(x, edge_index, batch, G, params)
    assert out.shape == (G, OUT_CLS)
    assert bool(jnp.all(jnp.isfinite(out)))
    assert jnp.allclose(out, ref, atol=2e-3, rtol=2e-3), (out, ref)

    print("KERNEL_OK")
</pallas_src>

<mosaic_0001>
module attributes {stable_mosaic.version = 11 : i64} {
  func.func @gcn_layer_kernel(%arg0: i32, %arg1: memref<128x128xbf16, #tpu.memory_space<vmem>>, %arg2: memref<128x128xbf16, #tpu.memory_space<vmem>>, %arg3: memref<128x128xbf16, #tpu.memory_space<vmem>>, %arg4: memref<1x128xf32, #tpu.memory_space<vmem>>, %arg5: memref<128x128xbf16, #tpu.memory_space<vmem>>) attributes {dimension_semantics = [#tpu.dimension_semantics<parallel>], iteration_bounds = array<i64: 1>, scalar_prefetch = 0 : i64, scratch_operands = 0 : i64, tpu.core_type = #tpu.core_type<tc>, window_params = [{transform_indices = @transform_0, window_bounds = array<i64: 128, 128>}, {pipeline_mode = #tpu.pipeline_mode<synchronous>, transform_indices = @transform_1, window_bounds = array<i64: 128, 128>}, {pipeline_mode = #tpu.pipeline_mode<synchronous>, transform_indices = @transform_2, window_bounds = array<i64: 128, 128>}, {pipeline_mode = #tpu.pipeline_mode<synchronous>, transform_indices = @transform_3, window_bounds = array<i64: 1, 128>}, {transform_indices = @transform_4, window_bounds = array<i64: 128, 128>}]} {
    %c0 = arith.constant 0 : index
    %c0_0 = arith.constant 0 : index
    %0 = vector.load %arg1[%c0, %c0_0] : memref<128x128xbf16, #tpu.memory_space<vmem>>, vector<128x128xbf16>
    %c0_1 = arith.constant 0 : index
    %c0_2 = arith.constant 0 : index
    %1 = vector.load %arg2[%c0_1, %c0_2] : memref<128x128xbf16, #tpu.memory_space<vmem>>, vector<128x128xbf16>
    %cst = arith.constant dense<0.000000e+00> : vector<128x128xf32>
    %2 = tpu.matmul %0, %1, %cst {dimension_numbers = #tpu.dot_dimension_numbers<[1], [0], [0], [1], [0, 0, 1, 1], [], []>} : vector<128x128xbf16>, vector<128x128xbf16>, vector<128x128xf32> -> vector<128x128xf32>
    %3 = arith.truncf %2 : vector<128x128xf32> to vector<128x128xbf16>
    %c0_3 = arith.constant 0 : index
    %c0_4 = arith.constant 0 : index
    %4 = vector.load %arg3[%c0_3, %c0_4] : memref<128x128xbf16, #tpu.memory_space<vmem>>, vector<128x128xbf16>
    %cst_5 = arith.constant dense<0.000000e+00> : vector<128x128xf32>
    %5 = tpu.matmul %3, %4, %cst_5 {dimension_numbers = #tpu.dot_dimension_numbers<[1], [0], [0], [1], [0, 0, 1, 1], [], []>} : vector<128x128xbf16>, vector<128x128xbf16>, vector<128x128xf32> -> vector<128x128xf32>
    %c0_6 = arith.constant 0 : index
    %c0_7 = arith.constant 0 : index
    %6 = vector.load %arg4[%c0_6, %c0_7] : memref<1x128xf32, #tpu.memory_space<vmem>>, vector<1x128xf32>
    %7 = vector.broadcast %6 : vector<1x128xf32> to vector<128x128xf32>
    %8 = arith.addf %5, %7 : vector<128x128xf32>
    %cst_8 = arith.constant 0.000000e+00 : f32
    %9 = vector.broadcast %cst_8 : f32 to vector<128x128xf32>
    %10 = arith.maximumf %8, %9 : vector<128x128xf32>
    %11 = arith.truncf %10 : vector<128x128xf32> to vector<128x128xbf16>
    %c0_9 = arith.constant 0 : index
    %c0_10 = arith.constant 0 : index
    %12 = vector.load %arg5[%c0_9, %c0_10] : memref<128x128xbf16, #tpu.memory_space<vmem>>, vector<128x128xbf16>
    tpu.vector_store %arg5[%c0_9, %c0_10], %11 {strides = array<i32>} : memref<128x128xbf16, #tpu.memory_space<vmem>>, vector<128x128xbf16>,
    return
  }
  func.func @transform_0(%arg0: i32) -> (i32, i32) {
    %c0_i32 = arith.constant 0 : i32
    %c0_i32_0 = arith.constant 0 : i32
    return %arg0, %c0_i32 : i32, i32
  }
  func.func @transform_1(%arg0: i32) -> (i32, i32) {
    %c0_i32 = arith.constant 0 : i32
    %c0_i32_0 = arith.constant 0 : i32
    %c0_i32_1 = arith.constant 0 : i32
    return %c0_i32, %c0_i32_0 : i32, i32
  }
  func.func @transform_2(%arg0: i32) -> (i32, i32) {
    %c0_i32 = arith.constant 0 : i32
    %c0_i32_0 = arith.constant 0 : i32
    %c0_i32_1 = arith.constant 0 : i32
    return %c0_i32, %c0_i32_0 : i32, i32
  }
  func.func @transform_3(%arg0: i32) -> (i32, i32) {
    %c0_i32 = arith.constant 0 : i32
    %c0_i32_0 = arith.constant 0 : i32
    %c0_i32_1 = arith.constant 0 : i32
    return %c0_i32, %c0_i32_0 : i32, i32
  }
  func.func @transform_4(%arg0: i32) -> (i32, i32) {
    %c0_i32 = arith.constant 0 : i32
    %c0_i32_0 = arith.constant 0 : i32
    return %arg0, %c0_i32 : i32, i32
  }
}

</mosaic_0001>

<bundles_post_ra>
// kernel: tpu_custom_call.1
= control target key start
LH: loop header
LB: loop body
LE: loop exit
PB: predicated region body
PF: predicated region fallthrough
CT: control target
= control target key end

     0   :  { %9 = vsyncpa [#allocation3], 0  ;;  %s785_s0 = inlined_call_operand.hbm [shape: bf16[128,128], index: 0, kind: input, shape index: {}]   ;;  %s786_s1 = inlined_call_operand.hbm [shape: bf16[128,128], index: 1, kind: input, shape index: {}]   ;;  %s787_s2 = inlined_call_operand.hbm [shape: bf16[128,128], index: 2, kind: input, shape index: {}]   ;;  %s788_s3 = inlined_call_operand.vmem [shape: f32[1,128], index: 3, kind: input, shape index: {}]   ;;  %s789_s4 = inlined_call_operand.hbm [shape: bf16[128,128], index: 4, kind: output, shape index: {}]  }
   0x1   :  { %10 = vsyncpa [#allocation6], 0 }
   0x2   :  { %11 = vsyncpa [#allocation4], 0  ;;  %s29_s17 = sshll.u32 %s786_s1, 4  ;;  %s727_s18 = smov [#allocation5]   ;;  %s30_s17 = int_to_ptr.hbm [resolvable:$true] %s29_s17 }
   0x3   :  { %s31_s19 = sshll.u32 %s727_s18, 4  ;;  %s16_s22 = sshll.u32 %s785_s0, 4  ;;  %s32_s19 = int_to_ptr.vmem [resolvable:$true] %s31_s19  ;;  %s17_s22 = int_to_ptr.hbm [resolvable:$true] %s16_s22 }
   0x4   :  { %s728_s23 = smov 64   ;;  %s729_s24 = smov 4  }
   0x5   :  { %37 = dma.hbm_to_vmem [thread:$0]  %s30_s17, 1024, %s32_s19, [#allocation6], %s728_s23, %s728_s23, %s729_s24  }
   0x6   :  { %s730_s25 = smov [#allocation2]   ;;  %s42_s1 = sshll.u32 %s787_s2, 4  ;;  %s43_s1 = int_to_ptr.hbm [resolvable:$true] %s42_s1 }
   0x7   :  { %s18_s26 = sshll.u32 %s730_s25, 4  ;;  %s731_s0 = smov [#allocation7]   ;;  %s19_s26 = int_to_ptr.vmem [resolvable:$true] %s18_s26 }
   0x8   :  { %24 = dma.hbm_to_vmem [thread:$0]  %s17_s22, 1024, %s19_s26, [#allocation3], %s728_s23, %s728_s23, %s729_s24  }
   0x9   :  { %s44_s29 = sshll.u32 %s731_s0, 4  ;;  %s45_s29 = int_to_ptr.vmem [resolvable:$true] %s44_s29 }
   0xa   :  { %50 = dma.hbm_to_vmem [thread:$0]  %s43_s1, 1024, %s45_s29, [#allocation6], %s728_s23, %s728_s23, %s729_s24  }
   0xb   :  { %721 = dma.done.wait [#allocation3], 1024  }
   0xc   :  { %722 = vsyncadd [#allocation3], 4294966272 }
   0xd   :  { %723 = dma.done.wait [#allocation6], 2048  }
   0xe   :  { %724 = vsyncadd [#allocation6], 4294965248  ;;  %v546_v0 = vld [vmem:[#allocation5 + $0x38] sm:$0xff]  ;;  %v545_v1 = vld [vmem:[#allocation5 + $0x30] sm:$0xff]  ;;  %s421_s8 = sshll.u32 %s789_s4, 4  ;;  %s422_s8 = int_to_ptr.hbm [resolvable:$true] %s421_s8 }
   0xf   :  { %193 = vmatpush.bf16.msra.mxu0 %v546_v0  ;;  %602 = vmatpush.bf16.msra.mxu2 %v546_v0  ;;  %v544_v2 = vld [vmem:[#allocation5 + $0x28] sm:$0xff]  ;;  %v543_v3 = vld [vmem:[#allocation5 + $0x20] sm:$0xff]  ;;  %v542_v4 = vld [vmem:[#allocation5 + $0x18] sm:$0xff] }
  0x10   :  { %v541_v5 = vld [vmem:[#allocation5 + $0x10] sm:$0xff]  ;;  %v540_v6 = vld [vmem:[#allocation5 + $0x8] sm:$0xff]  ;;  %v539_v7 = vld [vmem:[#allocation5] sm:$0xff] }
  0x11   :  { %v531_v8 = vld [vmem:[#allocation2] sm:$0xff]  ;;  %v532_v10 = vld [vmem:[#allocation2 + $0x8] sm:$0xff]  ;;  %v554_v12 = vld [vmem:[#allocation7 + $0x38] sm:$0xff] }
  0x12   :  { %v535_v9 = vld [vmem:[#allocation2 + $0x20] sm:$0xff]  ;;  %v536_v11 = vld [vmem:[#allocation2 + $0x28] sm:$0xff]  ;;  %318 = vmatpush.bf16.msra.mxu1 %v554_v12  ;;  %v553_v13 = vld [vmem:[#allocation7 + $0x30] sm:$0xff]  ;;  %610 = vmatpush.bf16.msra.mxu3 %v554_v12 }
  0x13   :  { %194 = vmatpush.bf16.msra.mxu0 %v545_v1  ;;  %603 = vmatpush.bf16.msra.mxu2 %v545_v1  ;;  %v552_v14 = vld [vmem:[#allocation7 + $0x28] sm:$0xff]  ;;  %v551_v15 = vld [vmem:[#allocation7 + $0x20] sm:$0xff]  ;;  %v533_v16 = vld [vmem:[#allocation2 + $0x10] sm:$0xff] }
  0x14   :  { %v537_v17 = vld [vmem:[#allocation2 + $0x30] sm:$0xff]  ;;  %v550_v18 = vld [vmem:[#allocation7 + $0x18] sm:$0xff]  ;;  %v548_v22 = vld [vmem:[#allocation7 + $0x8] sm:$0xff] }
  0x15   :  { %v534_v19 = vld [vmem:[#allocation2 + $0x18] sm:$0xff]  ;;  %v549_v21 = vld [vmem:[#allocation7 + $0x10] sm:$0xff]  ;;  %v547_v23 = vld [vmem:[#allocation7] sm:$0xff] }
  0x16   :  { %319 = vmatpush.bf16.msra.mxu1 %v553_v13  ;;  %611 = vmatpush.bf16.msra.mxu3 %v553_v13  ;;  %v538_v20 = vld [vmem:[#allocation2 + $0x38] sm:$0xff]  ;;  %v624_v49 = vld [vmem:[%s788_s3] ss:$0 sm:$0xff]  ;;  %s732_s3 = smov [#allocation8]  }
  0x17   :  { %195 = vmatpush.bf16.msra.mxu0 %v544_v2  ;;  %604 = vmatpush.bf16.msra.mxu2 %v544_v2  ;;  %s419_s5 = sshll.u32 %s732_s3, 4  ;;  %s420_s5 = int_to_ptr.vmem [resolvable:$true] %s419_s5 }
  0x1a   :  { %320 = vmatpush.bf16.msra.mxu1 %v552_v14  ;;  %612 = vmatpush.bf16.msra.mxu3 %v552_v14 }
  0x1b   :  { %196 = vmatpush.bf16.msra.mxu0 %v543_v3  ;;  %605 = vmatpush.bf16.msra.mxu2 %v543_v3 }
  0x1e   :  { %321 = vmatpush.bf16.msra.mxu1 %v551_v15  ;;  %613 = vmatpush.bf16.msra.mxu3 %v551_v15 }
  0x1f   :  { %197 = vmatpush.bf16.msra.mxu0 %v542_v4  ;;  %606 = vmatpush.bf16.msra.mxu2 %v542_v4 }
  0x22   :  { %322 = vmatpush.bf16.msra.mxu1 %v550_v18  ;;  %614 = vmatpush.bf16.msra.mxu3 %v550_v18 }
  0x23   :  { %198 = vmatpush.bf16.msra.mxu0 %v541_v5  ;;  %607 = vmatpush.bf16.msra.mxu2 %v541_v5 }
  0x26   :  { %323 = vmatpush.bf16.msra.mxu1 %v549_v21  ;;  %615 = vmatpush.bf16.msra.mxu3 %v549_v21 }
  0x27   :  { %199 = vmatpush.bf16.msra.mxu0 %v540_v6  ;;  %608 = vmatpush.bf16.msra.mxu2 %v540_v6 }
  0x2a   :  { %324 = vmatpush.bf16.msra.mxu1 %v548_v22  ;;  %616 = vmatpush.bf16.msra.mxu3 %v548_v22 }
  0x2b   :  { %200 = vmatpush.bf16.msra.mxu0 %v539_v7  ;;  %609 = vmatpush.bf16.msra.mxu2 %v539_v7 }
  0x2e   :  { %201 = vmatmul.bf16.vlgmr.msra.gmra.mxu0 %v531_v8  ;;  %221 = vmatmul.bf16.vlgmr.msra.gmra.mxu2 %v535_v9 }
  0x2f   :  { %325 = vmatpush.bf16.msra.mxu1 %v547_v23  ;;  %617 = vmatpush.bf16.msra.mxu3 %v547_v23 }
  0x3e   :  { %206 = vmatmul.bf16.gmra.mxu0 %v532_v10  ;;  %226 = vmatmul.bf16.gmra.mxu2 %v536_v11 }
  0x4e   :  { %211 = vmatmul.bf16.gmra.mxu0 %v533_v16  ;;  %231 = vmatmul.bf16.gmra.mxu2 %v537_v17 }
  0x5e   :  { %216 = vmatmul.bf16.gmra.mxu0 %v534_v19  ;;  %236 = vmatmul.bf16.gmra.mxu2 %v538_v20 }
  0xab   :  { %v202_v24 = vpop.f32.mrf.mxu0 }
  0xb1   :  { %v222_v25 = vpop.f32.mrf.mxu2 }
  0xb3   :  { %v204_v26 = vpop.f32.mrf.mxu0 }
  0xb4   :  { %v242_v27 = vpack.c.bf16 %v204_v26, %v202_v24 }
  0xb6   :  { %326 = vmatmul.bf16.vlgmr.msra.gmra.mxu1 %v242_v27 }
  0xb9   :  { %v224_v28 = vpop.f32.mrf.mxu2 }
  0xba   :  { %v246_v29 = vpack.c.bf16 %v224_v28, %v222_v25 }
  0xbb   :  { %v207_v30 = vpop.f32.mrf.mxu0 }
  0xbc   :  { %346 = vmatmul.bf16.vlgmr.msra.gmra.mxu3 %v246_v29 }
  0xc1   :  { %v227_v31 = vpop.f32.mrf.mxu2 }
  0xc3   :  { %v209_v32 = vpop.f32.mrf.mxu0 }
  0xc4   :  { %v243_v33 = vpack.c.bf16 %v209_v32, %v207_v30 }
  0xc6   :  { %331 = vmatmul.bf16.gmra.mxu1 %v243_v33 }
  0xc9   :  { %v229_v34 = vpop.f32.mrf.mxu2 }
  0xca   :  { %v247_v35 = vpack.c.bf16 %v229_v34, %v227_v31 }
  0xcb   :  { %v212_v36 = vpop.f32.mrf.mxu0 }
  0xcc   :  { %351 = vmatmul.bf16.gmra.mxu3 %v247_v35 }
  0xd1   :  { %v232_v37 = vpop.f32.mrf.mxu2 }
  0xd3   :  { %v214_v38 = vpop.f32.mrf.mxu0 }
  0xd4   :  { %v244_v39 = vpack.c.bf16 %v214_v38, %v212_v36 }
  0xd6   :  { %336 = vmatmul.bf16.gmra.mxu1 %v244_v39 }
  0xd9   :  { %v234_v40 = vpop.f32.mrf.mxu2 }
  0xda   :  { %v248_v41 = vpack.c.bf16 %v234_v40, %v232_v37 }
  0xdb   :  { %v217_v42 = vpop.f32.mrf.mxu0 }
  0xdc   :  { %356 = vmatmul.bf16.gmra.mxu3 %v248_v41 }
  0xe1   :  { %v237_v43 = vpop.f32.mrf.mxu2 }
  0xe3   :  { %v219_v44 = vpop.f32.mrf.mxu0 }
  0xe4   :  { %v245_v45 = vpack.c.bf16 %v219_v44, %v217_v42 }
  0xe6   :  { %341 = vmatmul.bf16.gmra.mxu1 %v245_v45 }
  0xe9   :  { %v239_v46 = vpop.f32.mrf.mxu2 }
  0xea   :  { %v249_v47 = vpack.c.bf16 %v239_v46, %v237_v43 }
  0xec   :  { %361 = vmatmul.bf16.gmra.mxu3 %v249_v47 }
 0x133   :  { %v327_v48 = vpop.f32.mrf.mxu1 }
 0x134   :  { %v328_v50 = vadd.f32 %v624_v49, %v327_v48 }
 0x136   :  { %v367_v53 = vmax.f32 %v328_v50, 0.0 }
 0x13b   :  { %v329_v51 = vpop.f32.mrf.mxu1 }
 0x13c   :  { %v330_v52 = vadd.f32 %v624_v49, %v329_v51 }
 0x13e   :  { %v368_v54 = vmax.f32 %v330_v52, 0.0 }
 0x13f   :  { %v347_v55 = vpop.f32.mrf.mxu3 }
 0x140   :  { %v558_v56 = vpack.c.bf16 %v368_v54, %v367_v53  ;;  %v348_v58 = vadd.f32 %v624_v49, %v347_v55 }
 0x142   :  { %559 = vst [vmem:[#allocation8] sm:$0xff] %v558_v56   ;;  %v375_v61 = vmax.f32 %v348_v58, 0.0 }
 0x143   :  { %v332_v57 = vpop.f32.mrf.mxu1 }
 0x144   :  { %v333_v62 = vadd.f32 %v624_v49, %v332_v57 }
 0x146   :  { %v369_v3 = vmax.f32 %v333_v62, 0.0 }
 0x147   :  { %v349_v59 = vpop.f32.mrf.mxu3 }
 0x148   :  { %v350_v60 = vadd.f32 %v624_v49, %v349_v59 }
 0x14a   :  { %v376_v63 = vmax.f32 %v350_v60, 0.0 }
 0x14b   :  { %v334_v0 = vpop.f32.mrf.mxu1 }
 0x14c   :  { %v578_v1 = vpack.c.bf16 %v376_v63, %v375_v61  ;;  %v335_v2 = vadd.f32 %v624_v49, %v334_v0 }
 0x14e   :  { %598 = vst [vmem:[#allocation8 + $0x20] sm:$0xff] %v578_v1   ;;  %v370_v4 = vmax.f32 %v335_v2, 0.0 }
 0x14f   :  { %v352_v5 = vpop.f32.mrf.mxu3 }
 0x150   :  { %v563_v6 = vpack.c.bf16 %v370_v4, %v369_v3  ;;  %v353_v8 = vadd.f32 %v624_v49, %v352_v5 }
 0x152   :  { %595 = vst [vmem:[#allocation8 + $0x8] sm:$0xff] %v563_v6   ;;  %v377_v11 = vmax.f32 %v353_v8, 0.0 }
 0x153   :  { %v337_v7 = vpop.f32.mrf.mxu1 }
 0x154   :  { %v338_v12 = vadd.f32 %v624_v49, %v337_v7 }
 0x156   :  { %v371_v17 = vmax.f32 %v338_v12, 0.0 }
 0x157   :  { %v354_v9 = vpop.f32.mrf.mxu3 }
 0x158   :  { %v355_v10 = vadd.f32 %v624_v49, %v354_v9 }
 0x15a   :  { %v378_v13 = vmax.f32 %v355_v10, 0.0 }
 0x15b   :  { %v339_v14 = vpop.f32.mrf.mxu1 }
 0x15c   :  { %v583_v15 = vpack.c.bf16 %v378_v13, %v377_v11  ;;  %v340_v16 = vadd.f32 %v624_v49, %v339_v14 }
 0x15e   :  { %599 = vst [vmem:[#allocation8 + $0x28] sm:$0xff] %v583_v15   ;;  %v372_v18 = vmax.f32 %v340_v16, 0.0 }
 0x15f   :  { %v357_v19 = vpop.f32.mrf.mxu3 }
 0x160   :  { %v568_v20 = vpack.c.bf16 %v372_v18, %v371_v17  ;;  %v358_v22 = vadd.f32 %v624_v49, %v357_v19 }
 0x162   :  { %596 = vst [vmem:[#allocation8 + $0x10] sm:$0xff] %v568_v20   ;;  %v379_v25 = vmax.f32 %v358_v22, 0.0 }
 0x163   :  { %v342_v21 = vpop.f32.mrf.mxu1 }
 0x164   :  { %v343_v26 = vadd.f32 %v624_v49, %v342_v21 }
 0x166   :  { %v373_v31 = vmax.f32 %v343_v26, 0.0 }
 0x167   :  { %v359_v23 = vpop.f32.mrf.mxu3 }
 0x168   :  { %v360_v24 = vadd.f32 %v624_v49, %v359_v23 }
 0x16a   :  { %v380_v27 = vmax.f32 %v360_v24, 0.0 }
 0x16b   :  { %v344_v28 = vpop.f32.mrf.mxu1 }
 0x16c   :  { %v588_v29 = vpack.c.bf16 %v380_v27, %v379_v25  ;;  %v345_v30 = vadd.f32 %v624_v49, %v344_v28 }
 0x16e   :  { %600 = vst [vmem:[#allocation8 + $0x30] sm:$0xff] %v588_v29   ;;  %v374_v32 = vmax.f32 %v345_v30, 0.0 }
 0x16f   :  { %v362_v33 = vpop.f32.mrf.mxu3 }
 0x170   :  { %v573_v34 = vpack.c.bf16 %v374_v32, %v373_v31  ;;  %v363_v35 = vadd.f32 %v624_v49, %v362_v33 }
 0x172   :  { %597 = vst [vmem:[#allocation8 + $0x18] sm:$0xff] %v573_v34   ;;  %v381_v38 = vmax.f32 %v363_v35, 0.0 }
 0x177   :  { %v364_v36 = vpop.f32.mrf.mxu3 }
 0x178   :  { %v365_v37 = vadd.f32 %v624_v49, %v364_v36 }
 0x17a   :  { %v382_v39 = vmax.f32 %v365_v37, 0.0 }
 0x17c   :  { %v593_v40 = vpack.c.bf16 %v382_v39, %v381_v38 }
 0x17e   :  { %601 = vst [vmem:[#allocation8 + $0x38] sm:$0xff] %v593_v40  }
 0x17f   :  { %427 = dma.vmem_to_hbm [thread:$0]  %s420_s5, 1024, %s422_s8, [#allocation4], %s728_s23, %s728_s23, %s729_s24  }
 0x180   :  { %725 = dma.done.wait [#allocation4], 1024  }
 0x181   :  { %726 = vsyncadd [#allocation4], 4294966272 }
 0x182   :  { %432 = vsyncpa [#allocation3], 1 }
 0x183   :  { %433 = vsyncpa [#allocation6], 1 }
 0x184   :  { %434 = vsyncpa [#allocation4], 1 }

</bundles_post_ra>
